<compile_context>
chip_gen: v5e
topology: v5e:2x2
jax: 0.10.0
libtpu: 0.0.40
codegen_flags: <defaults>
</compile_context>

<pallas_src>
import jax
import jax.numpy as jnp
from jax.experimental import pallas as pl
from jax.experimental.pallas import tpu as pltpu

D_NOISE = 100
NGF = 64
IMG_SIZE = 28
OUT_DIM = IMG_SIZE * IMG_SIZE  # 784


def _generator_kernel(x_ref, w1_ref, b1_ref, w2_ref, b2_ref, w3_ref, b3_ref,
                      out_ref):
    # x block: (bm, 100) f32 -> bf16 for the MXU; accumulate in f32.
    x = x_ref[...].astype(jnp.bfloat16)

    # Layer 1: Linear(100, 64) + ReLU      (Dropout -> identity in eval mode)
    h1 = jnp.dot(x, w1_ref[...], preferred_element_type=jnp.float32)
    h1 = jnp.maximum(h1 + b1_ref[...], 0.0)

    # Layer 2: Linear(64, 64) + ReLU       (Dropout -> identity in eval mode)
    h2 = jnp.dot(h1.astype(jnp.bfloat16), w2_ref[...],
                 preferred_element_type=jnp.float32)
    h2 = jnp.maximum(h2 + b2_ref[...], 0.0)

    # Layer 3: Linear(64, 784) + Tanh; store exactly 784 lanes, cast at store.
    h3 = jnp.dot(h2.astype(jnp.bfloat16), w3_ref[...],
                 preferred_element_type=jnp.float32)
    out_ref[...] = jnp.tanh(h3 + b3_ref[...]).astype(out_ref.dtype)


def _round_up(n, m):
    return (n + m - 1) // m * m


def generator_forward(x, params, *, block_m=1024, out_dtype=jnp.float32):
    """x: (B, 100) float32 -> (B, 784) `out_dtype` (default float32)."""
    w1, b1, w2, b2, w3, b3 = params
    B = x.shape[0]

    # Grid sizing: >= 2 steps so both v7x TensorCores get work, capped at
    # block_m rows/step, and balanced across steps so the ragged tail wastes
    # as little DMA/compute/writeback as possible.  bm multiple of 16 rows
    # keeps f32 and bf16 output tiles sublane-clean.
    num_steps = max(2, pl.cdiv(B, block_m))
    bm = min(block_m, _round_up(pl.cdiv(B, num_steps), 16))
    b_pad = _round_up(B, bm)

    # Row-only padding, and only when actually needed (no column pad of x).
    x_in = x if b_pad == B else jnp.pad(x, ((0, b_pad - B), (0, 0)))

    out = pl.pallas_call(
        _generator_kernel,
        out_shape=jax.ShapeDtypeStruct((b_pad, OUT_DIM), out_dtype),
        grid=(b_pad // bm,),
        in_specs=[
            pl.BlockSpec((bm, D_NOISE), lambda i: (i, 0)),     # x block
            pl.BlockSpec((D_NOISE, NGF), lambda i: (0, 0)),    # w1 (resident)
            pl.BlockSpec((1, NGF), lambda i: (0, 0)),          # b1
            pl.BlockSpec((NGF, NGF), lambda i: (0, 0)),        # w2
            pl.BlockSpec((1, NGF), lambda i: (0, 0)),          # b2
            pl.BlockSpec((NGF, OUT_DIM), lambda i: (0, 0)),    # w3
            pl.BlockSpec((1, OUT_DIM), lambda i: (0, 0)),      # b3
        ],
        out_specs=pl.BlockSpec((bm, OUT_DIM), lambda i: (i, 0)),
        compiler_params=pltpu.CompilerParams(
            dimension_semantics=("parallel",),
            vmem_limit_bytes=32 * 1024 * 1024),
    )(x_in, w1, b1, w2, b2, w3, b3)

    return out if b_pad == B else out[:B]


def init_params(key):
    """nn.Linear-style U(-1/sqrt(fan_in), 1/sqrt(fan_in)) init.

    Weights are stored transposed vs. PyTorch, i.e. (in_features, out_features),
    unpadded, cast to bfloat16.  Biases stay f32, kept 2-D (1, out) for
    TPU-friendly broadcasting.
    """
    ks = jax.random.split(key, 6)

    def lin(kw, kb, fan_in, fan_out):
        bound = 1.0 / (fan_in ** 0.5)
        w = jax.random.uniform(kw, (fan_in, fan_out), jnp.float32, -bound, bound)
        b = jax.random.uniform(kb, (1, fan_out), jnp.float32, -bound, bound)
        return w.astype(jnp.bfloat16), b

    w1, b1 = lin(ks[0], ks[1], D_NOISE, NGF)
    w2, b2 = lin(ks[2], ks[3], NGF, NGF)
    w3, b3 = lin(ks[4], ks[5], NGF, OUT_DIM)
    return (w1, b1, w2, b2, w3, b3)


def _reference_forward(x, params):
    """Pure-JAX reference with the same bf16/f32 arithmetic as the kernel."""
    w1, b1, w2, b2, w3, b3 = params
    h1 = jnp.maximum(
        jnp.dot(x.astype(jnp.bfloat16), w1,
                preferred_element_type=jnp.float32) + b1, 0.0)
    h2 = jnp.maximum(
        jnp.dot(h1.astype(jnp.bfloat16), w2,
                preferred_element_type=jnp.float32) + b2, 0.0)
    h3 = jnp.dot(h2.astype(jnp.bfloat16), w3,
                 preferred_element_type=jnp.float32) + b3
    return jnp.tanh(h3)


if __name__ == "__main__":
    key = jax.random.PRNGKey(0)
    k_params, k_x1, k_x2 = jax.random.split(key, 3)

    params = init_params(k_params)

    # Small batch: single grid step (bm clamped to 16).
    x_small = jax.random.normal(k_x1, (8, D_NOISE), dtype=jnp.float32)
    out_small = jax.block_until_ready(generator_forward(x_small, params))
    ref_small = _reference_forward(x_small, params)
    assert out_small.shape == (8, OUT_DIM), out_small.shape
    assert out_small.dtype == jnp.float32
    assert jnp.allclose(out_small, ref_small, atol=1e-3, rtol=1e-3), \
        "mismatch vs JAX reference (small batch)"

    # Ragged batch: 2-step grid (bm=160, batch padded only 300->320), resident
    # weights across steps, exact-width 784 output stores.
    x_big = jax.random.normal(k_x2, (300, D_NOISE), dtype=jnp.float32)
    out_big = jax.block_until_ready(generator_forward(x_big, params))
    ref_big = _reference_forward(x_big, params)
    assert out_big.shape == (300, OUT_DIM), out_big.shape
    assert jnp.allclose(out_big, ref_big, atol=1e-3, rtol=1e-3), \
        "mismatch vs JAX reference (gridded batch)"

    # Optional reduced-precision output path (halves output HBM traffic).
    out_bf16 = jax.block_until_ready(
        generator_forward(x_big, params, out_dtype=jnp.bfloat16))
    assert out_bf16.shape == (300, OUT_DIM) and out_bf16.dtype == jnp.bfloat16
    assert jnp.allclose(out_bf16.astype(jnp.float32), ref_big,
                        atol=1e-2, rtol=1e-2), \
        "mismatch vs JAX reference (bf16 output)"

    print("KERNEL_OK")
</pallas_src>

<mosaic_0001>
module attributes {stable_mosaic.version = 11 : i64} {
  func.func @_generator_kernel(%arg0: i32, %arg1: memref<16x100xf32, #tpu.memory_space<vmem>>, %arg2: memref<100x64xbf16, #tpu.memory_space<vmem>>, %arg3: memref<1x64xf32, #tpu.memory_space<vmem>>, %arg4: memref<64x64xbf16, #tpu.memory_space<vmem>>, %arg5: memref<1x64xf32, #tpu.memory_space<vmem>>, %arg6: memref<64x784xbf16, #tpu.memory_space<vmem>>, %arg7: memref<1x784xf32, #tpu.memory_space<vmem>>, %arg8: memref<16x784xf32, #tpu.memory_space<vmem>>) attributes {dimension_semantics = [#tpu.dimension_semantics<parallel>], iteration_bounds = array<i64: 1>, scalar_prefetch = 0 : i64, scratch_operands = 0 : i64, tpu.core_type = #tpu.core_type<tc>, window_params = [{transform_indices = @transform_0, window_bounds = array<i64: 16, 100>}, {pipeline_mode = #tpu.pipeline_mode<synchronous>, transform_indices = @transform_1, window_bounds = array<i64: 100, 64>}, {pipeline_mode = #tpu.pipeline_mode<synchronous>, transform_indices = @transform_2, window_bounds = array<i64: 1, 64>}, {pipeline_mode = #tpu.pipeline_mode<synchronous>, transform_indices = @transform_3, window_bounds = array<i64: 64, 64>}, {pipeline_mode = #tpu.pipeline_mode<synchronous>, transform_indices = @transform_4, window_bounds = array<i64: 1, 64>}, {pipeline_mode = #tpu.pipeline_mode<synchronous>, transform_indices = @transform_5, window_bounds = array<i64: 64, 784>}, {pipeline_mode = #tpu.pipeline_mode<synchronous>, transform_indices = @transform_6, window_bounds = array<i64: 1, 784>}, {transform_indices = @transform_7, window_bounds = array<i64: 16, 784>}]} {
    %c0 = arith.constant 0 : index
    %c0_0 = arith.constant 0 : index
    %0 = vector.load %arg1[%c0, %c0_0] : memref<16x100xf32, #tpu.memory_space<vmem>>, vector<16x100xf32>
    %1 = arith.truncf %0 : vector<16x100xf32> to vector<16x100xbf16>
    %c0_1 = arith.constant 0 : index
    %c0_2 = arith.constant 0 : index
    %2 = vector.load %arg2[%c0_1, %c0_2] : memref<100x64xbf16, #tpu.memory_space<vmem>>, vector<100x64xbf16>
    %cst = arith.constant dense<0.000000e+00> : vector<16x64xf32>
    %3 = tpu.matmul %1, %2, %cst {dimension_numbers = #tpu.dot_dimension_numbers<[1], [0], [0], [1], [0, 0, 1, 1], [], []>} : vector<16x100xbf16>, vector<100x64xbf16>, vector<16x64xf32> -> vector<16x64xf32>
    %c0_3 = arith.constant 0 : index
    %c0_4 = arith.constant 0 : index
    %4 = vector.load %arg3[%c0_3, %c0_4] : memref<1x64xf32, #tpu.memory_space<vmem>>, vector<1x64xf32>
    %5 = vector.broadcast %4 : vector<1x64xf32> to vector<16x64xf32>
    %6 = arith.addf %3, %5 : vector<16x64xf32>
    %cst_5 = arith.constant 0.000000e+00 : f32
    %7 = vector.broadcast %cst_5 : f32 to vector<16x64xf32>
    %8 = arith.maximumf %6, %7 : vector<16x64xf32>
    %9 = arith.truncf %8 : vector<16x64xf32> to vector<16x64xbf16>
    %c0_6 = arith.constant 0 : index
    %c0_7 = arith.constant 0 : index
    %10 = vector.load %arg4[%c0_6, %c0_7] : memref<64x64xbf16, #tpu.memory_space<vmem>>, vector<64x64xbf16>
    %cst_8 = arith.constant dense<0.000000e+00> : vector<16x64xf32>
    %11 = tpu.matmul %9, %10, %cst_8 {dimension_numbers = #tpu.dot_dimension_numbers<[1], [0], [0], [1], [0, 0, 1, 1], [], []>} : vector<16x64xbf16>, vector<64x64xbf16>, vector<16x64xf32> -> vector<16x64xf32>
    %c0_9 = arith.constant 0 : index
    %c0_10 = arith.constant 0 : index
    %12 = vector.load %arg5[%c0_9, %c0_10] : memref<1x64xf32, #tpu.memory_space<vmem>>, vector<1x64xf32>
    %13 = vector.broadcast %12 : vector<1x64xf32> to vector<16x64xf32>
    %14 = arith.addf %11, %13 : vector<16x64xf32>
    %cst_11 = arith.constant 0.000000e+00 : f32
    %15 = vector.broadcast %cst_11 : f32 to vector<16x64xf32>
    %16 = arith.maximumf %14, %15 : vector<16x64xf32>
    %17 = arith.truncf %16 : vector<16x64xf32> to vector<16x64xbf16>
    %c0_12 = arith.constant 0 : index
    %c0_13 = arith.constant 0 : index
    %18 = vector.load %arg6[%c0_12, %c0_13] : memref<64x784xbf16, #tpu.memory_space<vmem>>, vector<64x784xbf16>
    %cst_14 = arith.constant dense<0.000000e+00> : vector<16x784xf32>
    %19 = tpu.matmul %17, %18, %cst_14 {dimension_numbers = #tpu.dot_dimension_numbers<[1], [0], [0], [1], [0, 0, 1, 1], [], []>} : vector<16x64xbf16>, vector<64x784xbf16>, vector<16x784xf32> -> vector<16x784xf32>
    %c0_15 = arith.constant 0 : index
    %c0_16 = arith.constant 0 : index
    %20 = vector.load %arg7[%c0_15, %c0_16] : memref<1x784xf32, #tpu.memory_space<vmem>>, vector<1x784xf32>
    %21 = vector.broadcast %20 : vector<1x784xf32> to vector<16x784xf32>
    %22 = arith.addf %19, %21 : vector<16x784xf32>
    %23 = math.tanh %22 : vector<16x784xf32>
    %c0_17 = arith.constant 0 : index
    %c0_18 = arith.constant 0 : index
    %24 = vector.load %arg8[%c0_17, %c0_18] : memref<16x784xf32, #tpu.memory_space<vmem>>, vector<16x784xf32>
    tpu.vector_store %arg8[%c0_17, %c0_18], %23 {strides = array<i32>} : memref<16x784xf32, #tpu.memory_space<vmem>>, vector<16x784xf32>,
    return
  }
  func.func @transform_0(%arg0: i32) -> (i32, i32) {
    %c0_i32 = arith.constant 0 : i32
    %c0_i32_0 = arith.constant 0 : i32
    return %arg0, %c0_i32 : i32, i32
  }
  func.func @transform_1(%arg0: i32) -> (i32, i32) {
    %c0_i32 = arith.constant 0 : i32
    %c0_i32_0 = arith.constant 0 : i32
    %c0_i32_1 = arith.constant 0 : i32
    return %c0_i32, %c0_i32_0 : i32, i32
  }
  func.func @transform_2(%arg0: i32) -> (i32, i32) {
    %c0_i32 = arith.constant 0 : i32
    %c0_i32_0 = arith.constant 0 : i32
    %c0_i32_1 = arith.constant 0 : i32
    return %c0_i32, %c0_i32_0 : i32, i32
  }
  func.func @transform_3(%arg0: i32) -> (i32, i32) {
    %c0_i32 = arith.constant 0 : i32
    %c0_i32_0 = arith.constant 0 : i32
    %c0_i32_1 = arith.constant 0 : i32
    return %c0_i32, %c0_i32_0 : i32, i32
  }
  func.func @transform_4(%arg0: i32) -> (i32, i32) {
    %c0_i32 = arith.constant 0 : i32
    %c0_i32_0 = arith.constant 0 : i32
    %c0_i32_1 = arith.constant 0 : i32
    return %c0_i32, %c0_i32_0 : i32, i32
  }
  func.func @transform_5(%arg0: i32) -> (i32, i32) {
    %c0_i32 = arith.constant 0 : i32
    %c0_i32_0 = arith.constant 0 : i32
    %c0_i32_1 = arith.constant 0 : i32
    return %c0_i32, %c0_i32_0 : i32, i32
  }
  func.func @transform_6(%arg0: i32) -> (i32, i32) {
    %c0_i32 = arith.constant 0 : i32
    %c0_i32_0 = arith.constant 0 : i32
    %c0_i32_1 = arith.constant 0 : i32
    return %c0_i32, %c0_i32_0 : i32, i32
  }
  func.func @transform_7(%arg0: i32) -> (i32, i32) {
    %c0_i32 = arith.constant 0 : i32
    %c0_i32_0 = arith.constant 0 : i32
    return %arg0, %c0_i32 : i32, i32
  }
}

</mosaic_0001>

<bundles_post_ra>
// kernel: tpu_custom_call.1
= control target key start
LH: loop header
LB: loop body
LE: loop exit
PB: predicated region body
PF: predicated region fallthrough
CT: control target
= control target key end

     0   :  { %12 = vsyncpa [#allocation3], 0  ;;  %s932_s0 = inlined_call_operand.vmem [shape: f32[16,100], index: 0, kind: input, shape index: {}]   ;;  %s933_s1 = inlined_call_operand.vmem [shape: bf16[100,64], index: 1, kind: input, shape index: {}]   ;;  %s934_s2 = inlined_call_operand.vmem [shape: f32[1,64], index: 2, kind: input, shape index: {}]   ;;  %s935_s3 = inlined_call_operand.vmem [shape: bf16[64,64], index: 3, kind: input, shape index: {}]   ;;  %s936_s4 = inlined_call_operand.vmem [shape: f32[1,64], index: 4, kind: input, shape index: {}]   ;;  %s937_s5 = inlined_call_operand.hbm [shape: bf16[64,784], index: 5, kind: input, shape index: {}]   ;;  %s938_s6 = inlined_call_operand.vmem [shape: f32[1,784], index: 6, kind: input, shape index: {}]   ;;  %s939_s7 = inlined_call_operand.hbm [shape: f32[16,784], index: 7, kind: output, shape index: {}]  }
   0x1   :  { %13 = vsyncpa [#allocation4], 0  ;;  %s28_s26 = sshll.u32 %s937_s5, 4  ;;  %s813_s27 = smov [#allocation2]   ;;  %s29_s26 = int_to_ptr.hbm [resolvable:$true] %s28_s26 }
   0x2   :  { %s30_s28 = sshll.u32 %s813_s27, 4  ;;  %s814_s29 = smov 448   ;;  %s31_s28 = int_to_ptr.vmem [resolvable:$true] %s30_s28 }
   0x3   :  { %s815_s30 = smov 28  }
   0x4   :  { %36 = dma.hbm_to_vmem [thread:$0]  %s29_s26, 3584, %s31_s28, [#allocation3], %s814_s29, %s814_s29, %s815_s30  }
   0x5   :  { %809 = dma.done.wait [#allocation3], 3584  }
   0x6   :  { %810 = vsyncadd [#allocation3], 4294963712  ;;  %v59_v0 = vld [vmem:[%s933_s1 + $0x30] sm:$0x3]  ;;  %vm107_vm0 = vcmask 1041408   ;;  %v692_v4 = vld [vmem:[%s933_s1 + $0x28] sm:$0xff] }
   0x7   :  { %v89_v1 = vunpack.c.l.b16 %v59_v0  ;;  %v691_v5 = vld [vmem:[%s933_s1 + $0x20] sm:$0xff]  ;;  %v690_v6 = vld [vmem:[%s933_s1 + $0x18] sm:$0xff]  ;;  %v689_v7 = vld [vmem:[%s933_s1 + $0x10] sm:$0xff]  ;;  %vm103_vm1 = vcmask 818176   ;;  %vm164_vm2 = vcmask 523264   ;;  %vm498_vm3 = vcmask 130048  }
   0x8   :  { %v688_v8 = vld [vmem:[%s933_s1 + $0x8] sm:$0xff]  ;;  %v687_v9 = vld [vmem:[%s933_s1] sm:$0xff]  ;;  %v696_v13 = vld [vmem:[%s935_s3 + $0x18] sm:$0xff]  ;;  %s513_s13 = sshll.u32 %s939_s7, 4  ;;  %s817_s14 = smov 896   ;;  %s514_s13 = int_to_ptr.hbm [resolvable:$true] %s513_s13 }
   0x9   :  { %v96_v2 = vpack.c.b16 %v89_v1, %v89_v1  ;;  %v44_v10 = vld [vmem:[%s932_s0] sm:$0xff]  ;;  %v45_v11 = vld [vmem:[%s932_s0 + $0x8] sm:$0xff]  ;;  %172 = vmatpush.bf16.msra.mxu1 %v696_v13  ;;  %v695_v14 = vld [vmem:[%s935_s3 + $0x10] sm:$0xff]  ;;  %s818_s15 = smov 56  }
   0xa   :  { %v46_v12 = vpack.c.bf16 %v45_v11, %v44_v10  ;;  %v694_v15 = vld [vmem:[%s935_s3 + $0x8] sm:$0xff]  ;;  %v693_v16 = vld [vmem:[%s935_s3] sm:$0xff]  ;;  %v662_v30 = vld [vmem:[#allocation2 + $0xb0] sm:$0xf] }
   0xb   :  { %v109_v3 = vsel %vm107_vm0, %v96_v2, 0  ;;  %v731_v18 = vld [vmem:[%s934_s2] ss:$0 sm:$0xff]  ;;  %v654_v25 = vld [vmem:[#allocation2 + $0xa8] sm:$0xf] }
   0xc   :  { %112 = vmatpush.bf16.msra.mxu0 %v109_v3  ;;  %v721_v26 = vld [vmem:[#allocation2 + $0xc0] sm:$0xf0]  ;;  %v718_v27 = vld [vmem:[#allocation2 + $0xac] sm:$0xf]  ;;  %v656_v29 = vld [vmem:[#allocation2 + $0xc4] sm:$0xf0] }
   0xd   :  { %173 = vmatpush.bf16.msra.mxu1 %v695_v14  ;;  %v655_v28 = vor.u32 %v721_v26, %v654_v25  ;;  %v722_v31 = vld [vmem:[#allocation2 + $0xc8] sm:$0xf0]  ;;  %v659_v32 = vor.u32 %v718_v27, %v656_v29  ;;  %v720_v34 = vld [vmem:[#allocation2 + $0xbc] sm:$0xf]  ;;  %v672_v35 = vld [vmem:[#allocation2 + $0xd4] sm:$0xf0] }
   0xe   :  { %v663_v33 = vor.u32 %v722_v31, %v662_v30  ;;  %v675_v36 = vor.u32 %v720_v34, %v672_v35  ;;  %v626_v37 = vld [vmem:[#allocation2 + $0x70] sm:$0xf]  ;;  %v714_v38 = vld [vmem:[#allocation2 + $0x88] sm:$0xf0]  ;;  %v711_v39 = vld [vmem:[#allocation2 + $0x74] sm:$0xf] }
   0xf   :  { %384 = vmatpush.bf16.msra.mxu2 %v655_v28  ;;  %398 = vmatpush.bf16.msra.mxu3 %v659_v32  ;;  %v627_v40 = vor.u32 %v714_v38, %v626_v37  ;;  %v628_v41 = vld [vmem:[#allocation2 + $0x8c] sm:$0xf0]  ;;  %v634_v42 = vld [vmem:[#allocation2 + $0x78] sm:$0xf]  ;;  %v715_v43 = vld [vmem:[#allocation2 + $0x90] sm:$0xf0] }
  0x10   :  { %113 = vmatpush.bf16.msra.mxu0 %v692_v4  ;;  %v631_v44 = vor.u32 %v711_v39, %v628_v41  ;;  %v635_v45 = vor.u32 %v715_v43, %v634_v42  ;;  %v713_v46 = vld [vmem:[#allocation2 + $0x84] sm:$0xf]  ;;  %v644_v47 = vld [vmem:[#allocation2 + $0x9c] sm:$0xf0]  ;;  %v598_v49 = vld [vmem:[#allocation2 + $0x38] sm:$0xf] }
  0x11   :  { %174 = vmatpush.bf16.msra.mxu1 %v694_v15  ;;  %v647_v48 = vor.u32 %v713_v46, %v644_v47  ;;  %v707_v50 = vld [vmem:[#allocation2 + $0x50] sm:$0xf0]  ;;  %v704_v51 = vld [vmem:[#allocation2 + $0x3c] sm:$0xf]  ;;  %v600_v53 = vld [vmem:[#allocation2 + $0x54] sm:$0xf0] }
  0x12   :  { %v599_v52 = vor.u32 %v707_v50, %v598_v49  ;;  %v606_v54 = vld [vmem:[#allocation2 + $0x40] sm:$0xf]  ;;  %v708_v55 = vld [vmem:[#allocation2 + $0x58] sm:$0xf0]  ;;  %v603_v56 = vor.u32 %v704_v51, %v600_v53  ;;  %v706_v58 = vld [vmem:[#allocation2 + $0x4c] sm:$0xf] }
  0x13   :  { %385 = vmatpush.bf16.msra.mxu2 %v627_v40  ;;  %399 = vmatpush.bf16.msra.mxu3 %v631_v44  ;;  %v607_v57 = vor.u32 %v708_v55, %v606_v54  ;;  %v616_v59 = vld [vmem:[#allocation2 + $0x64] sm:$0xf0]  ;;  %v570_v61 = vld [vmem:[#allocation2] sm:$0xf]  ;;  %v700_v62 = vld [vmem:[#allocation2 + $0x18] sm:$0xf0] }
  0x14   :  { %114 = vmatpush.bf16.msra.mxu0 %v691_v5  ;;  %v619_v60 = vor.u32 %v706_v58, %v616_v59  ;;  %v697_v63 = vld [vmem:[#allocation2 + $0x4] sm:$0xf]  ;;  %v571_v0 = vor.u32 %v700_v62, %v570_v61  ;;  %v572_v1 = vld [vmem:[#allocation2 + $0x1c] sm:$0xf0]  ;;  %v578_v2 = vld [vmem:[#allocation2 + $0x8] sm:$0xf] }
  0x15   :  { %175 = vmatpush.bf16.msra.mxu1 %v693_v16  ;;  %v701_v3 = vld [vmem:[#allocation2 + $0x20] sm:$0xf0]  ;;  %v575_v4 = vor.u32 %v697_v63, %v572_v1  ;;  %v664_v10 = vld [vmem:[#allocation2 + $0xcc] sm:$0xf0]  ;;  %v670_v11 = vld [vmem:[#allocation2 + $0xb8] sm:$0xf] }
  0x16   :  { %v579_v5 = vor.u32 %v701_v3, %v578_v2  ;;  %v723_v13 = vld [vmem:[#allocation2 + $0xd0] sm:$0xf0]  ;;  %v678_v14 = vld [vmem:[#allocation2 + $0xc0] sm:$0xf]  ;;  %v724_v15 = vld [vmem:[#allocation2 + $0xd8] sm:$0xf0] }
  0x17   :  { %386 = vmatpush.bf16.msra.mxu2 %v599_v52  ;;  %400 = vmatpush.bf16.msra.mxu3 %v603_v56  ;;  %v671_v16 = vor.u32 %v723_v13, %v670_v11  ;;  %v705_v27 = vld [vmem:[#allocation2 + $0x44] sm:$0xf]  ;;  %v608_v28 = vld [vmem:[#allocation2 + $0x5c] sm:$0xf0]  ;;  %v614_v29 = vld [vmem:[#allocation2 + $0x48] sm:$0xf] }
  0x18   :  { %115 = vmatpush.bf16.msra.mxu0 %v690_v6  ;;  %v699_v6 = vld [vmem:[#allocation2 + $0x14] sm:$0xf]  ;;  %v709_v30 = vld [vmem:[#allocation2 + $0x60] sm:$0xf0]  ;;  %v622_v31 = vld [vmem:[#allocation2 + $0x50] sm:$0xf] }
  0x19   :  { %412 = vmatpush.bf16.msrb.mxu1 %v663_v33  ;;  %v710_v32 = vld [vmem:[#allocation2 + $0x68] sm:$0xf0]  ;;  %v611_v33 = vor.u32 %v705_v27, %v608_v28  ;;  %v615_v34 = vor.u32 %v709_v30, %v614_v29  ;;  %v580_v37 = vld [vmem:[#allocation2 + $0x24] sm:$0xf0]  ;;  %v586_v38 = vld [vmem:[#allocation2 + $0x10] sm:$0xf] }
  0x1a   :  { %v623_v35 = vor.u32 %v710_v32, %v622_v31  ;;  %v702_v39 = vld [vmem:[#allocation2 + $0x28] sm:$0xf0]  ;;  %v594_v40 = vld [vmem:[#allocation2 + $0x18] sm:$0xf]  ;;  %v703_v41 = vld [vmem:[#allocation2 + $0x30] sm:$0xf0] }
  0x1b   :  { %387 = vmatpush.bf16.msra.mxu2 %v571_v0  ;;  %401 = vmatpush.bf16.msra.mxu3 %v575_v4  ;;  %v587_v43 = vor.u32 %v702_v39, %v586_v38  ;;  %v595_v44 = vor.u32 %v703_v41, %v594_v40  ;;  %v732_v46 = vld [vmem:[%s936_s4] ss:$0 sm:$0xff] }
  0x1c   :  { %116 = vmatpush.bf16.msra.mxu0 %v689_v7  ;;  %v588_v7 = vld [vmem:[#allocation2 + $0x2c] sm:$0xf0]  ;;  %v918_v53 = vld [vmem:[%s938_s6] sm:$0x7f]  ;;  %s816_s6 = smov [#allocation5]  }
  0x1d   :  { %413 = vmatpush.bf16.msrb.mxu1 %v635_v45  ;;  %v221_v54 = vperm.slane %v918_v53, 2  ;;  %v224_v55 = vperm.slane %v918_v53, 5  ;;  %v220_v61 = vperm.slane %v918_v53, 1  ;;  %s511_s5 = sshll.u32 %s816_s6, 4  ;;  %s512_s5 = int_to_ptr.vmem [resolvable:$true] %s511_s5 }
  0x1f   :  { %440 = vmatpush.bf16.msrb.mxu3 %v671_v16 }
  0x20   :  { %117 = vmatpush.bf16.msra.mxu0 %v688_v8  ;;  %v591_v8 = vor.u32 %v699_v6, %v588_v7 }
  0x21   :  { %414 = vmatpush.bf16.msrb.mxu1 %v607_v57 }
  0x24   :  { %118 = vmatpush.bf16.msra.mxu0 %v687_v9  ;;  %v719_v9 = vld [vmem:[#allocation2 + $0xb4] sm:$0xf] }
  0x25   :  { %415 = vmatpush.bf16.msrb.mxu1 %v579_v5 }
  0x27   :  { %550 = vmatmul.msk.bf16.vlgmr.msra.gmra.mxu0 %vm103_vm1, %v46_v12  ;;  %v667_v12 = vor.u32 %v719_v9, %v664_v10  ;;  %v225_v10 = vperm.slane %v918_v53, 6 }
  0x28   :  { %454 = vmatpush.bf16.msrb.mxu0 %v675_v36  ;;  %v698_v36 = vld [vmem:[#allocation2 + $0xc] sm:$0xf] }
  0x29   :  { %426 = vmatpush.bf16.msrb.mxu2 %v667_v12  ;;  %v583_v42 = vor.u32 %v698_v36, %v580_v37 }
  0x2c   :  { %455 = vmatpush.bf16.msrb.mxu0 %v647_v48 }
  0x30   :  { %456 = vmatpush.bf16.msrb.mxu0 %v619_v60  ;;  %v219_v60 = vperm.slane %v918_v53, 0 }
  0x34   :  { %457 = vmatpush.bf16.msrb.mxu0 %v591_v8 }
  0xa4   :  { %v120_v17 = vpop.f32.mrf.mxu0 }
  0xa5   :  { %v121_v19 = vadd.f32 %v731_v18, %v120_v17  ;;  %v679_v17 = vor.u32 %v724_v15, %v678_v14 }
  0xa7   :  { %v125_v22 = vmax.f32 %v121_v19, 0.0  ;;  %v636_v19 = vld [vmem:[#allocation2 + $0x94] sm:$0xf0] }
  0xac   :  { %v122_v20 = vpop.f32.mrf.mxu0 }
  0xad   :  { %v123_v21 = vadd.f32 %v731_v18, %v122_v20  ;;  %v712_v18 = vld [vmem:[#allocation2 + $0x7c] sm:$0xf]  ;;  %v642_v20 = vld [vmem:[#allocation2 + $0x80] sm:$0xf] }
  0xaf   :  { %v126_v23 = vmax.f32 %v123_v21, 0.0  ;;  %v639_v21 = vor.u32 %v712_v18, %v636_v19  ;;  %v222_v19 = vperm.slane %v918_v53, 3 }
  0xb1   :  { %v127_v24 = vpack.c.bf16 %v126_v23, %v125_v22  ;;  %v716_v22 = vld [vmem:[#allocation2 + $0x98] sm:$0xf0]  ;;  %v650_v23 = vld [vmem:[#allocation2 + $0x88] sm:$0xf]  ;;  %427 = vmatpush.bf16.msrb.mxu2 %v639_v21 }
  0xb2   :  { %v643_v25 = vor.u32 %v716_v22, %v642_v20  ;;  %v223_v20 = vperm.slane %v918_v53, 4 }
  0xb3   :  { %567 = vmatmul.msk.bf16.vlgmr.msra.gmra.mxu1 %vm164_vm2, %v127_v24  ;;  %v717_v24 = vld [vmem:[#allocation2 + $0xa0] sm:$0xf0] }
  0xb4   :  { %468 = vmatpush.bf16.msra.mxu1 %v679_v17  ;;  %v651_v26 = vor.u32 %v717_v24, %v650_v23  ;;  %441 = vmatpush.bf16.msrb.mxu3 %v643_v25 }
  0xb5   :  { %428 = vmatpush.bf16.msrb.mxu2 %v611_v33 }
  0xb8   :  { %469 = vmatpush.bf16.msra.mxu1 %v651_v26  ;;  %442 = vmatpush.bf16.msrb.mxu3 %v615_v34 }
  0xb9   :  { %429 = vmatpush.bf16.msrb.mxu2 %v583_v42 }
  0xbc   :  { %470 = vmatpush.bf16.msra.mxu1 %v623_v35  ;;  %443 = vmatpush.bf16.msrb.mxu3 %v587_v43 }
  0xc0   :  { %471 = vmatpush.bf16.msra.mxu1 %v595_v44 }
 0x130   :  { %v177_v45 = vpop.f32.mrf.mxu1 }
 0x131   :  { %v178_v47 = vadd.f32 %v732_v46, %v177_v45 }
 0x133   :  { %v182_v50 = vmax.f32 %v178_v47, 0.0 }
 0x138   :  { %v179_v48 = vpop.f32.mrf.mxu1 }
 0x139   :  { %v180_v49 = vadd.f32 %v732_v46, %v179_v48 }
 0x13b   :  { %v183_v51 = vmax.f32 %v180_v49, 0.0 }
 0x13d   :  { %v184_v52 = vpack.c.bf16 %v183_v51, %v182_v50 }
 0x13f   :  { %680 = vmatmul.msk.bf16.vlgmr.msra.gmra.mxu2 %vm164_vm2, %v184_v52  ;;  %681 = vmatmul.msk.bf16.vlgmr.msra.gmra.mxu3 %vm164_vm2, %v184_v52 }
 0x140   :  { %682 = vmatmul.msk.bf16.vlgmr.msrb.gmra.mxu1 %vm164_vm2, %v184_v52  ;;  %685 = vmatmul.msk.bf16.vlgmr.msrb.gmra.mxu0 %vm164_vm2, %v184_v52 }
 0x14f   :  { %683 = vmatmul.msk.bf16.vlgmr.msrb.gmra.mxu2 %vm164_vm2, %v184_v52  ;;  %684 = vmatmul.msk.bf16.vlgmr.msrb.gmra.mxu3 %vm164_vm2, %v184_v52 }
 0x150   :  { %686 = vmatmul.msk.bf16.vlgmr.msra.gmra.mxu1 %vm164_vm2, %v184_v52 }
 0x1bd   :  { %v417_v56 = vpop.f32.mrf.mxu1  ;;  %v459_v57 = vpop.f32.mrf.mxu0 }
 0x1be   :  { %v418_v58 = vadd.f32 %v417_v56, %v221_v54  ;;  %v460_v59 = vadd.f32 %v459_v57, %v224_v55 }
 0x1c0   :  { %733 = vtanh.f32 %v418_v58 }
 0x1c1   :  { %735 = vtanh.f32 %v460_v59 }
 0x1c2   :  { %v389_v62 = vpop.f32.mrf.mxu2  ;;  %v403_v63 = vpop.f32.mrf.mxu3 }
 0x1c3   :  { %v390_v0 = vadd.f32 %v389_v62, %v219_v60  ;;  %v404_v1 = vadd.f32 %v403_v63, %v220_v61 }
 0x1c5   :  { %737 = vtanh.f32 %v390_v0  ;;  %v419_v2 = vpop.f32.mrf.mxu1  ;;  %v461_v3 = vpop.f32.mrf.mxu0 }
 0x1c6   :  { %v734_v4 = vpop.eup %733  ;;  %739 = vtanh.f32 %v404_v1  ;;  %v420_v5 = vadd.f32 %v419_v2, %v221_v54  ;;  %v462_v6 = vadd.f32 %v461_v3, %v224_v55 }
 0x1c7   :  { %v736_v7 = vpop.eup %735  ;;  %494 = vst [vmem:[#allocation5 + $0x10] sm:$0xff] %v734_v4 }
 0x1c8   :  { %497 = vst [vmem:[#allocation5 + $0x28] sm:$0xff] %v736_v7  ;;  %741 = vtanh.f32 %v420_v5 }
 0x1c9   :  { %743 = vtanh.f32 %v462_v6 }
 0x1ca   :  { %v391_v8 = vpop.f32.mrf.mxu2  ;;  %v405_v9 = vpop.f32.mrf.mxu3 }
 0x1cb   :  { %v738_v11 = vpop.eup %737  ;;  %v392_v12 = vadd.f32 %v391_v8, %v219_v60  ;;  %v406_v13 = vadd.f32 %v405_v9, %v220_v61 }
 0x1cc   :  { %v740_v14 = vpop.eup %739  ;;  %492 = vst [vmem:[#allocation5] sm:$0xff] %v738_v11 }
 0x1cd   :  { %493 = vst [vmem:[#allocation5 + $0x8] sm:$0xff] %v740_v14  ;;  %745 = vtanh.f32 %v392_v12  ;;  %v473_v15 = vpop.f32.mrf.mxu1 }
 0x1ce   :  { %v742_v16 = vpop.eup %741  ;;  %747 = vtanh.f32 %v406_v13  ;;  %v474_v17 = vadd.f32 %v473_v15, %v225_v10 }
 0x1cf   :  { %v744_v18 = vpop.eup %743  ;;  %502 = vst [vmem:[#allocation5 + $0x48] sm:$0xff] %v742_v16 }
 0x1d0   :  { %505 = vst [vmem:[#allocation5 + $0x60] sm:$0xff] %v744_v18  ;;  %749 = vtanh.f32 %v474_v17 }
 0x1d2   :  { %v431_v21 = vpop.f32.mrf.mxu2  ;;  %v445_v22 = vpop.f32.mrf.mxu3 }
 0x1d3   :  { %v746_v23 = vpop.eup %745  ;;  %v432_v24 = vadd.f32 %v431_v21, %v222_v19  ;;  %v446_v25 = vadd.f32 %v445_v22, %v223_v20 }
 0x1d4   :  { %v748_v26 = vpop.eup %747  ;;  %500 = vst [vmem:[#allocation5 + $0x38] sm:$0xff] %v746_v23 }
 0x1d5   :  { %501 = vst [vmem:[#allocation5 + $0x40] sm:$0xff] %v748_v26  ;;  %751 = vtanh.f32 %v432_v24  ;;  %v475_v27 = vpop.f32.mrf.mxu1 }
 0x1d6   :  { %v750_v28 = vpop.eup %749  ;;  %753 = vtanh.f32 %v446_v25  ;;  %v476_v29 = vadd.f32 %v475_v27, %v225_v10 }
 0x1d7   :  { %499 = vst.msk [vmem:[#allocation5 + $0x30] sm:$0xff] %vm498_vm3, %v750_v28 }
 0x1d8   :  { %755 = vtanh.f32 %v476_v29 }
 0x1da   :  { %v433_v30 = vpop.f32.mrf.mxu2  ;;  %v447_v31 = vpop.f32.mrf.mxu3 }
 0x1db   :  { %v752_v32 = vpop.eup %751  ;;  %v434_v33 = vadd.f32 %v433_v30, %v222_v19  ;;  %v448_v34 = vadd.f32 %v447_v31, %v223_v20 }
 0x1dc   :  { %v754_v35 = vpop.eup %753  ;;  %495 = vst [vmem:[#allocation5 + $0x18] sm:$0xff] %v752_v32 }
 0x1dd   :  { %496 = vst [vmem:[#allocation5 + $0x20] sm:$0xff] %v754_v35  ;;  %757 = vtanh.f32 %v434_v33 }
 0x1de   :  { %v756_v36 = vpop.eup %755  ;;  %759 = vtanh.f32 %v448_v34 }
 0x1df   :  { %506 = vst.msk [vmem:[#allocation5 + $0x68] sm:$0xff] %vm498_vm3, %v756_v36 }
 0x1e3   :  { %v758_v37 = vpop.eup %757 }
 0x1e4   :  { %v760_v38 = vpop.eup %759  ;;  %503 = vst [vmem:[#allocation5 + $0x50] sm:$0xff] %v758_v37 }
 0x1e5   :  { %504 = vst [vmem:[#allocation5 + $0x58] sm:$0xff] %v760_v38 }
 0x1e6   :  { %519 = dma.vmem_to_hbm [thread:$0]  %s512_s5, 1792, %s514_s13, [#allocation4], %s817_s14, %s817_s14, %s818_s15  }
 0x1e7   :  { %811 = dma.done.wait [#allocation4], 1792  }
 0x1e8   :  { %812 = vsyncadd [#allocation4], 4294965504 }
 0x1e9   :  { %524 = vsyncpa [#allocation3], 1 }
 0x1ea   :  { %525 = vsyncpa [#allocation4], 1 }

</bundles_post_ra>
